<compile_context>
chip_gen: v7x
topology: tpu7x:2x2x1
jax: 0.10.0
libtpu: 0.0.40
codegen_flags: <defaults>
</compile_context>

<pallas_src>
from functools import partial

import jax
import jax.numpy as jnp
from jax.experimental import pallas as pl
from jax.experimental.pallas import tpu as pltpu


def _make_single_block_kernel(w0, w1, inv_n):
    """Whole problem in one VMEM block: no phases, no scratch."""

    def kernel(p_ref, t_ref, o_ref):
        d = p_ref[...].astype(jnp.float32) - t_ref[...].astype(jnp.float32)
        fused = w0 * (d * d) + w1 * jnp.abs(d)  # fused weighted per-element loss
        o_ref[...] = jnp.full((1, 1), jnp.sum(fused) * inv_n, dtype=jnp.float32)

    return kernel


def _make_tiled_kernel(w0, w1, inv_n):
    """Streaming reduction: VPU-only elementwise accumulation into a VMEM
    vector accumulator; single final cross-lane reduction + scale at the
    last grid step."""

    def kernel(p_ref, t_ref, o_ref, acc_ref):
        i = pl.program_id(0)

        @pl.when(i == 0)
        def _():
            acc_ref[...] = jnp.zeros_like(acc_ref)

        d = p_ref[...].astype(jnp.float32) - t_ref[...].astype(jnp.float32)
        # One fused weighted accumulator instead of separate MSE / MAE sums.
        acc_ref[...] += w0 * (d * d) + w1 * jnp.abs(d)

        @pl.when(i == pl.num_programs(0) - 1)
        def _():
            o_ref[...] = jnp.full(
                (1, 1), jnp.sum(acc_ref[...]) * inv_n, dtype=jnp.float32
            )

    return kernel


@partial(jax.jit, static_argnames=("weights", "max_tile_rows"))
def weighted_combined_losses(preds, targets, weights=(0.7, 0.3), max_tile_rows=2048):
    """Returns a (1,)-shaped float32 array:  w0*MSE + w1*L1  (mean reductions)."""
    assert preds.shape == targets.shape
    assert max_tile_rows % 8 == 0

    n_elems = preds.size
    lanes = 128
    w0, w1 = float(weights[0]), float(weights[1])
    inv_n = 1.0 / float(n_elems)

    # --- flatten + zero-pad to an (8, 128)-aligned (padded_rows, 128) slab ---
    rows = -(-n_elems // lanes)                      # ceil-div
    if rows <= max_tile_rows:
        row_tile = ((rows + 7) // 8) * 8             # single block, sublane aligned
        padded_rows = row_tile
    else:
        row_tile = max_tile_rows
        padded_rows = ((rows + row_tile - 1) // row_tile) * row_tile
    pad = padded_rows * lanes - n_elems

    p_flat = preds.reshape(-1)
    t_flat = targets.reshape(-1)
    if pad:
        p_flat = jnp.pad(p_flat, (0, pad))
        t_flat = jnp.pad(t_flat, (0, pad))
    p2 = p_flat.reshape(padded_rows, lanes)
    t2 = t_flat.reshape(padded_rows, lanes)

    num_tiles = padded_rows // row_tile

    if num_tiles == 1:
        # Single-invocation fast path: whole slab as one block, no accumulator.
        out = pl.pallas_call(
            _make_single_block_kernel(w0, w1, inv_n),
            out_shape=jax.ShapeDtypeStruct((1, 1), jnp.float32),
            grid=(1,),
            in_specs=[
                pl.BlockSpec((padded_rows, lanes), lambda i: (0, 0)),
                pl.BlockSpec((padded_rows, lanes), lambda i: (0, 0)),
            ],
            out_specs=pl.BlockSpec((1, 1), lambda i: (0, 0)),
        )(p2, t2)
    else:
        # Streaming path for large inputs: big lane-aligned tiles, VMEM vector
        # accumulator, single final reduction.
        out = pl.pallas_call(
            _make_tiled_kernel(w0, w1, inv_n),
            out_shape=jax.ShapeDtypeStruct((1, 1), jnp.float32),
            grid_spec=pltpu.PrefetchScalarGridSpec(
                num_scalar_prefetch=0,
                grid=(num_tiles,),
                in_specs=[
                    pl.BlockSpec((row_tile, lanes), lambda i: (i, 0)),
                    pl.BlockSpec((row_tile, lanes), lambda i: (i, 0)),
                ],
                out_specs=pl.BlockSpec((1, 1), lambda i: (0, 0)),
                scratch_shapes=[pltpu.VMEM((row_tile, lanes), jnp.float32)],
            ),
            compiler_params=pltpu.CompilerParams(
                dimension_semantics=("arbitrary",),  # reduction axis, output resident
            ),
        )(p2, t2)

    return out.reshape(1)  # matches torch.zeros(1) accumulator shape


def _reference(preds, targets, weights=(0.7, 0.3)):
    d = preds.astype(jnp.float32) - targets.astype(jnp.float32)
    mse = jnp.mean(d * d)
    mae = jnp.mean(jnp.abs(d))
    return (weights[0] * mse + weights[1] * mae).reshape(1)


if __name__ == "__main__":
    key = jax.random.PRNGKey(0)
    k1, k2 = jax.random.split(key)
    # NCHW inputs, small shapes: batch=2, channels=4, spatial=16x16.
    preds = jax.random.normal(k1, (2, 4, 16, 16), dtype=jnp.float32)
    targets = jax.random.normal(k2, (2, 4, 16, 16), dtype=jnp.float32)

    ref = _reference(preds, targets)

    # Default path: single-block kernel (16x128 slab -> one grid step).
    out = jax.block_until_ready(weighted_combined_losses(preds, targets))
    assert out.shape == (1,)
    assert jnp.allclose(out, ref, rtol=1e-5, atol=1e-5), (out, ref)

    # Force the streaming/tiled path (small max_tile_rows -> grid=(2,)) to
    # validate the large-input code path on hardware as well.
    out_tiled = jax.block_until_ready(
        weighted_combined_losses(preds, targets, max_tile_rows=8)
    )
    assert out_tiled.shape == (1,)
    assert jnp.allclose(out_tiled, ref, rtol=1e-5, atol=1e-5), (out_tiled, ref)

    print("KERNEL_OK")
</pallas_src>

<mosaic_0001>
module attributes {stable_mosaic.version = 11 : i64} {
  func.func @kernel(%arg0: i32, %arg1: memref<16x128xf32, #tpu.memory_space<vmem>>, %arg2: memref<16x128xf32, #tpu.memory_space<vmem>>, %arg3: memref<1x1xf32, #tpu.memory_space<vmem>>) attributes {dimension_semantics = [#tpu.dimension_semantics<arbitrary>], iteration_bounds = array<i64: 1>, scalar_prefetch = 0 : i64, scratch_operands = 0 : i64, tpu.core_type = #tpu.core_type<tc>, window_params = [{pipeline_mode = #tpu.pipeline_mode<synchronous>, transform_indices = @transform_0, window_bounds = array<i64: 16, 128>}, {pipeline_mode = #tpu.pipeline_mode<synchronous>, transform_indices = @transform_1, window_bounds = array<i64: 16, 128>}, {pipeline_mode = #tpu.pipeline_mode<synchronous>, transform_indices = @transform_2, window_bounds = array<i64: 1, 1>}]} {
    %c0 = arith.constant 0 : index
    %c0_0 = arith.constant 0 : index
    %0 = vector.load %arg1[%c0, %c0_0] : memref<16x128xf32, #tpu.memory_space<vmem>>, vector<16x128xf32>
    %c0_1 = arith.constant 0 : index
    %c0_2 = arith.constant 0 : index
    %1 = vector.load %arg2[%c0_1, %c0_2] : memref<16x128xf32, #tpu.memory_space<vmem>>, vector<16x128xf32>
    %2 = arith.subf %0, %1 : vector<16x128xf32>
    %3 = arith.mulf %2, %2 : vector<16x128xf32>
    %cst = arith.constant 0.699999988 : f32
    %4 = vector.broadcast %cst : f32 to vector<16x128xf32>
    %5 = arith.mulf %4, %3 : vector<16x128xf32>
    %6 = math.absf %2 : vector<16x128xf32>
    %cst_3 = arith.constant 3.000000e-01 : f32
    %7 = vector.broadcast %cst_3 : f32 to vector<16x128xf32>
    %8 = arith.mulf %7, %6 : vector<16x128xf32>
    %9 = arith.addf %5, %8 : vector<16x128xf32>
    %10 = vector.shape_cast %9 : vector<16x128xf32> to vector<1x16x128xf32>
    %cst_4 = arith.constant dense<0.000000e+00> : vector<1xf32>
    %11 = vector.multi_reduction <add>, %10, %cst_4 [1, 2] : vector<1x16x128xf32> to vector<1xf32>
    %12 = vector.shape_cast %11 : vector<1xf32> to vector<1x1x1xf32>
    %13 = vector.extract %12[0, 0, 0] : f32 from vector<1x1x1xf32>
    %cst_5 = arith.constant 4.8828125E-4 : f32
    %14 = arith.mulf %13, %cst_5 : f32
    %15 = vector.broadcast %14 : f32 to vector<1x1xf32>
    %c0_6 = arith.constant 0 : index
    %c0_7 = arith.constant 0 : index
    %16 = vector.load %arg3[%c0_6, %c0_7] : memref<1x1xf32, #tpu.memory_space<vmem>>, vector<1x1xf32>
    tpu.vector_store %arg3[%c0_6, %c0_7], %15 {strides = array<i32>} : memref<1x1xf32, #tpu.memory_space<vmem>>, vector<1x1xf32>,
    return
  }
  func.func @transform_0(%arg0: i32) -> (i32, i32) {
    %c0_i32 = arith.constant 0 : i32
    %c0_i32_0 = arith.constant 0 : i32
    %c0_i32_1 = arith.constant 0 : i32
    return %c0_i32, %c0_i32_0 : i32, i32
  }
  func.func @transform_1(%arg0: i32) -> (i32, i32) {
    %c0_i32 = arith.constant 0 : i32
    %c0_i32_0 = arith.constant 0 : i32
    %c0_i32_1 = arith.constant 0 : i32
    return %c0_i32, %c0_i32_0 : i32, i32
  }
  func.func @transform_2(%arg0: i32) -> (i32, i32) {
    %c0_i32 = arith.constant 0 : i32
    %c0_i32_0 = arith.constant 0 : i32
    %c0_i32_1 = arith.constant 0 : i32
    return %c0_i32, %c0_i32_0 : i32, i32
  }
}

</mosaic_0001>

<bundles_post_ra>
// kernel: weighted_combined_losses.1
= control target key start
LH: loop header
LB: loop body
LE: loop exit
PB: predicated region body
PF: predicated region fallthrough
CT: control target
= control target key end

     0   :  { %s123_s0 = inlined_call_operand.vmem [shape: f32[16,128], index: 0, kind: input, shape index: {}]   ;;  %s124_s1 = inlined_call_operand.vmem [shape: f32[16,128], index: 1, kind: input, shape index: {}]   ;;  %s125_s2 = inlined_call_operand.hbm [shape: f32[1,1], index: 2, kind: output, shape index: {}]  }
   0x1   :  { %v12_v0 = vld [vmem:[%s123_s0] sm:$0xff]  ;;  %v13_v1 = vld [vmem:[%s123_s0 + $0x8] sm:$0xff] }
   0x2   :  { %v14_v2 = vld [vmem:[%s124_s1] sm:$0xff]  ;;  %v15_v3 = vld [vmem:[%s124_s1 + $0x8] sm:$0xff] }
   0x3   :  { %v16_v4 = vsub.f32 %v12_v0, %v14_v2 }
   0x4   :  { %7 = vsyncpa [#allocation3], 0  ;;  %v17_v5 = vsub.f32 %v13_v1, %v15_v3  ;;  %s83_s0 = smov [#allocation2]   ;;  %vm40_vm0 = vcmask 0  }
   0x5   :  { %v18_v6 = vmul.f32 %v16_v4, %v16_v4  ;;  %v22_v7 = vand.u32 2147483647, %v16_v4  ;;  %s48_s1 = sshll.u32 %s83_s0, 4  ;;  %s49_s1 = int_to_ptr.vmem [resolvable:$true] %s48_s1 }
   0x6   :  { %v19_v8 = vmul.f32 %v17_v5, %v17_v5  ;;  %v23_v9 = vand.u32 2147483647, %v17_v5  ;;  %s59_s19 = scalar_lea.vmem %s49_s1, 16  ;;  %s63_s20 = scalar_lea.vmem %s49_s1, 32 }
   0x7   :  { %v20_v10 = vmul.f32 0.7, %v18_v6  ;;  %v24_v11 = vmul.f32 0.3, %v22_v7  ;;  %p60_p0 = scmp.ne.s32.totalorder %s49_s1, %s59_s19  ;;  %p64_p1 = scmp.lt.s32.totalorder %s49_s1, %s49_s1 }
   0x8   :  { %v21_v12 = vmul.f32 0.7, %v19_v8  ;;  %v25_v13 = vmul.f32 0.3, %v23_v9  ;;  %p65_p2 = scmp.lt.s32.totalorder %s63_s20, %s59_s19 }
   0x9   :  { %v26_v14 = vadd.f32 %v24_v11, %v20_v10 }
   0xa   :  { %v27_v15 = vadd.f32 %v25_v13, %v21_v12  ;;  %p66_p3 = por %p65_p2, %p64_p1 }
   0xc   :  { %v28_v16 = vadd.f32 %v27_v15, %v26_v14  ;;  %p67_p4 = pnand %p66_p3, %p60_p0 }
   0xe   :  { %29 = vadd.xlane.f32.xlu0 %v28_v16 }
  0x9b   :  { %v30_v17 = vpop.xlane.xlu0 %29 }
  0x9c   :  { %v31_v18 = vrot.slane %v30_v17, 4 }
  0x9e   :  { %v32_v19 = vadd.f32 %v31_v18, %v30_v17 }
  0xa0   :  { %v33_v20 = vrot.slane %v32_v19, 2 }
  0xa2   :  { %v34_v21 = vadd.f32 %v33_v20, %v32_v19 }
  0xa4   :  { %v35_v22 = vrot.slane %v34_v21, 1 }
  0xa6   :  { %v36_v23 = vadd.f32 %v35_v22, %v34_v21 }
  0xa8   :  { %56 = vpush %v36_v23 }
  0xd9   :  { %s57_s17 = spop %56 }
  0xda   :  { %s38_s18 = smul.f32 0.00048828125, %s57_s17 }
  0xdc   :  { %v39_v24 = vstv %s38_s18 }
  0xdd   :  { %41 = vst.msk [vmem:[#allocation2] sm:$0x1] %vm40_vm0, %v39_v24 }
  0xde   :  { %70 = shalt.err (!%p67_p4)
}
  0xdf   :  { %s71_s23 = scalar_lea.hbm %s125_s2, 16 }
  0xe0   :  { %p72_p5 = scmp.ne.s32.totalorder %s125_s2, %s71_s23  ;;  %p75_p6 = scmp.lt.u32.totalorder %s71_s23, %s125_s2 }
  0xe2   :  { %p77_p7 = pnand %p75_p6, %p72_p5 }
  0xe4   :  { %80 = shalt.err (!%p77_p7)
}
  0xe5   :  { %51 = dma.vmem_to_hbm [thread:$0]  %s49_s1, 16, %s125_s2, [#allocation3]  }
  0xe6   :  { %81 = dma.done.wait [#allocation3], 16  }
  0xe7   :  { %82 = vsyncadd [#allocation3], 4294967280 }
  0xe8   :  { %55 = vsyncpa [#allocation3], 1 }

</bundles_post_ra>
